<compile_context>
chip_gen: v5e
topology: v5e:2x2
jax: 0.10.0
libtpu: 0.0.40
codegen_flags: <defaults>
</compile_context>

<pallas_src>
import functools

import jax
import jax.numpy as jnp
from jax.experimental import pallas as pl
from jax.experimental.pallas import tpu as pltpu

_LANES = 128
_SUBLANES = 8


def _round_up(x, m):
    return ((x + m - 1) // m) * m


def _kl_decorr_kernel(n_ref, o_ref, y_ref, od0_ref, od1_ref, acc_ref, *,
                      c, tile_rows, inner_grid):
    co = pl.program_id(0)          # "parallel" axis (one accumulator per core)
    i = pl.program_id(1)           # "arbitrary" sequential reduction axis

    @pl.when(i == 0)
    def _():
        acc_ref[...] = jnp.zeros_like(acc_ref)

    n_true = n_ref[0]
    tile_elems = tile_rows * _LANES
    tile_base = (co * inner_grid + i) * tile_elems

    @pl.when(tile_base < n_true)          # skip fully-padded tiles entirely
    def _():
        o = o_ref[...]        # (tile_rows, 128) predicted prob of class 0
        yv = y_ref[...]       # binary label
        od0 = od0_ref[...]    # bookmaker odds, outcome 0
        od1 = od1_ref[...]    # bookmaker odds, outcome 1

        # --- BCELoss(reduction='none'); PyTorch clamps the log terms at -100.
        log_o = jnp.maximum(jnp.log(o), -100.0)
        log_1mo = jnp.maximum(jnp.log(1.0 - o), -100.0)
        bce = -(yv * log_o + (1.0 - yv) * log_1mo)

        # --- probabilities = L1-normalize([o + 1e-3, 1 - o + 1e-3]).
        # The L1 norm is exactly 1.002 because BCELoss requires o in [0, 1].
        inv_norm = jnp.float32(1.0 / 1.002)
        p0 = (o + 0.001) * inv_norm
        p1 = (1.001 - o) * inv_norm

        # --- booker_probabilities = L1-normalize(1/odds, dim=1).  For
        # positive odds this is exactly [od1, od0] / (od0 + od1): one exact
        # divide (no stacked approximate reciprocals).
        inv_s = 1.0 / (od0 + od1)
        b0 = od1 * inv_s
        b1 = od0 * inv_s

        # --- KL(b || p) summed over the 2 outcomes (log-difference form).
        kl = (b0 * (jnp.log(b0) - jnp.log(p0))
              + b1 * (jnp.log(b1) - jnp.log(p1)))
        # TODO(synk): the torch.isnan(...) -> print() debug branch is not replicated.

        vals = bce - c * kl

        def _accumulate(v):
            # Plain vector adds into the vreg-shaped accumulator; the single
            # cross-lane reduction + mean happens once, in the JAX wrapper.
            acc_ref[...] += jnp.sum(
                v.reshape(tile_rows // _SUBLANES, _SUBLANES, _LANES), axis=0
            ).reshape(1, _SUBLANES, _LANES)

        tile_end = tile_base + tile_elems

        @pl.when(tile_end <= n_true)      # interior tile: no mask needed
        def _():
            _accumulate(vals)

        @pl.when(tile_end > n_true)       # boundary tile: mask batch padding
        def _():
            row = jax.lax.broadcasted_iota(jnp.int32, (tile_rows, _LANES), 0)
            lane = jax.lax.broadcasted_iota(jnp.int32, (tile_rows, _LANES), 1)
            gidx = tile_base + row * _LANES + lane
            _accumulate(jnp.where(gidx < n_true, vals, 0.0))


def kl_decorrelation_loss(output, y, odds, c, *,
                          max_tile_rows=2048, num_core_blocks=2):
    """Pallas implementation of KLDecorrelationLoss.forward; returns a scalar.

    max_tile_rows=2048 -> 4 x 1 MiB input blocks (8 MiB double-buffered),
    inside the scoped-VMEM default on every generation incl. v5e (16 MiB).
    num_core_blocks=2 shards the row tiles over a leading "parallel" axis so
    v7x megacore runs the halves concurrently; on 1-TC chips it runs
    sequentially with negligible overhead.
    """
    n = output.shape[0]

    out_f = output.astype(jnp.float32).reshape(-1)
    y_f = y.astype(jnp.float32).reshape(-1)
    odds_f = odds.astype(jnp.float32)

    rows = max(1, -(-n // _LANES))                     # ceil(n / 128)
    rows = _round_up(rows, _SUBLANES)                  # sublane alignment
    tile_rows = min(max(_SUBLANES, _round_up(max_tile_rows, _SUBLANES)), rows)
    total_tiles = -(-rows // tile_rows)
    inner_grid = -(-total_tiles // num_core_blocks)
    rows_padded = num_core_blocks * inner_grid * tile_rows
    n_padded = rows_padded * _LANES

    def slab(v, fill):
        # Layout plumbing only: flatten / pad / reshape to a lane-dense slab.
        v = jnp.pad(v, (0, n_padded - n), constant_values=fill)
        return v.reshape(rows_padded, _LANES)

    # Safe fill values so padded lanes never hit log(0) / 1/0 (they are also
    # masked or skipped inside the kernel).
    o_slab = slab(out_f, 0.5)
    y_slab = slab(y_f, 0.0)
    od0_slab = slab(odds_f[:, 0], 2.0)
    od1_slab = slab(odds_f[:, 1], 2.0)

    n_smem = jnp.array([n], dtype=jnp.int32)

    kernel = functools.partial(_kl_decorr_kernel, c=float(c),
                               tile_rows=tile_rows, inner_grid=inner_grid)

    row_map = lambda co, i, n_s: (co * inner_grid + i, 0)
    in_spec = pl.BlockSpec((tile_rows, _LANES), row_map)

    partial_sums = pl.pallas_call(
        kernel,
        out_shape=jax.ShapeDtypeStruct((num_core_blocks, _SUBLANES, _LANES),
                                       jnp.float32),
        grid_spec=pltpu.PrefetchScalarGridSpec(
            num_scalar_prefetch=1,
            grid=(num_core_blocks, inner_grid),
            in_specs=[in_spec, in_spec, in_spec, in_spec],
            out_specs=pl.BlockSpec((1, _SUBLANES, _LANES),
                                   lambda co, i, n_s: (co, 0, 0)),
        ),
        compiler_params=pltpu.CompilerParams(
            dimension_semantics=("parallel", "arbitrary")),
    )(n_smem, o_slab, y_slab, od0_slab, od1_slab)

    return jnp.sum(partial_sums) / jnp.float32(n)


def _reference(output, y, odds, c):
    """Pure-JAX reference mirroring the PyTorch forward (exact divides)."""
    output = output.astype(jnp.float32)
    y = y.astype(jnp.float32)
    odds = odds.astype(jnp.float32)
    bce = -(y * jnp.maximum(jnp.log(output), -100.0)
            + (1.0 - y) * jnp.maximum(jnp.log(1.0 - output), -100.0))
    p = jnp.concatenate([output[:, 0:1] + 0.001, 1.0 - output[:, 0:1] + 0.001],
                        axis=1)
    p = p / jnp.maximum(jnp.sum(jnp.abs(p), axis=1, keepdims=True), 1e-12)
    b = 1.0 / odds
    b = b / jnp.maximum(jnp.sum(jnp.abs(b), axis=1, keepdims=True), 1e-12)
    kl = jnp.sum(b * jnp.log(b / p), axis=1, keepdims=True)
    return jnp.mean(bce - c * kl)


if __name__ == "__main__":
    key = jax.random.PRNGKey(0)
    c = 0.5

    def make_inputs(k, n):
        k1, k2, k3 = jax.random.split(k, 3)
        output = jax.nn.sigmoid(jax.random.normal(k1, (n, 1), dtype=jnp.float32))
        y = jax.random.bernoulli(k2, 0.5, (n, 1)).astype(jnp.float32)
        odds = jax.random.uniform(k3, (n, 2), dtype=jnp.float32,
                                  minval=1.5, maxval=4.0)
        return output, y, odds

    k1, k2 = jax.random.split(key)

    # Case 1: small batch -> one boundary tile on core 0, core 1 fully padded
    # (exercises lane padding, masking, and the skip-empty-tile path).
    output, y, odds = make_inputs(k1, 200)
    loss = jax.block_until_ready(kl_decorrelation_loss(output, y, odds, c))
    ref = _reference(output, y, odds, c)
    assert jnp.allclose(loss, ref, atol=1e-3, rtol=1e-3), (loss, ref)

    # Case 2: tiny tile to force grid > 1 per core (interior tiles, one
    # boundary tile, one fully-padded tile; exercises running accumulation
    # across the "arbitrary" axis and both accumulator blocks).
    output, y, odds = make_inputs(k2, 5000)
    loss = jax.block_until_ready(
        kl_decorrelation_loss(output, y, odds, c, max_tile_rows=8))
    ref = _reference(output, y, odds, c)
    assert jnp.allclose(loss, ref, atol=1e-3, rtol=1e-3), (loss, ref)

    print("KERNEL_OK")
</pallas_src>

<mosaic_0001>
module attributes {stable_mosaic.version = 11 : i64} {
  func.func @_kl_decorr_kernel(%arg0: i32, %arg1: i32, %arg2: memref<1xi32, #tpu.memory_space<smem>>, %arg3: memref<8x128xf32, #tpu.memory_space<vmem>>, %arg4: memref<8x128xf32, #tpu.memory_space<vmem>>, %arg5: memref<8x128xf32, #tpu.memory_space<vmem>>, %arg6: memref<8x128xf32, #tpu.memory_space<vmem>>, %arg7: memref<1x8x128xf32, #tpu.memory_space<vmem>>) attributes {dimension_semantics = [#tpu.dimension_semantics<parallel>, #tpu.dimension_semantics<arbitrary>], iteration_bounds = array<i64: 2, 1>, scalar_prefetch = 1 : i64, scratch_operands = 0 : i64, tpu.core_type = #tpu.core_type<tc>, window_params = [{transform_indices = @transform_0, window_bounds = array<i64: 8, 128>}, {transform_indices = @transform_1, window_bounds = array<i64: 8, 128>}, {transform_indices = @transform_2, window_bounds = array<i64: 8, 128>}, {transform_indices = @transform_3, window_bounds = array<i64: 8, 128>}, {transform_indices = @transform_4, window_bounds = array<i64: 1, 8, 128>}]} {
    %c0_i32 = arith.constant 0 : i32
    %0 = arith.cmpi eq, %arg1, %c0_i32 : i32
    %1 = arith.extui %0 : i1 to i32
    %c0_i32_0 = arith.constant 0 : i32
    %2 = arith.cmpi ne, %1, %c0_i32_0 : i32
    scf.if %2 {
      %cst = arith.constant 0.000000e+00 : f32
      %10 = vector.broadcast %cst : f32 to vector<1x8x128xf32>
      %c0_2 = arith.constant 0 : index
      %c0_3 = arith.constant 0 : index
      %c0_4 = arith.constant 0 : index
      %11 = vector.load %arg7[%c0_2, %c0_3, %c0_4] : memref<1x8x128xf32, #tpu.memory_space<vmem>>, vector<1x8x128xf32>
      tpu.vector_store %arg7[%c0_2, %c0_3, %c0_4], %10 {strides = array<i32>} : memref<1x8x128xf32, #tpu.memory_space<vmem>>, vector<1x8x128xf32>,
    } else {
    }
    %c0 = arith.constant 0 : index
    %3 = memref.load %arg2[%c0] : memref<1xi32, #tpu.memory_space<smem>>
    %c1_i32 = arith.constant 1 : i32
    %4 = arith.muli %arg0, %c1_i32 : i32
    %5 = arith.addi %4, %arg1 : i32
    %c1024_i32 = arith.constant 1024 : i32
    %6 = arith.muli %5, %c1024_i32 : i32
    %7 = arith.cmpi slt, %6, %3 : i32
    %8 = arith.extui %7 : i1 to i32
    %c0_i32_1 = arith.constant 0 : i32
    %9 = arith.cmpi ne, %8, %c0_i32_1 : i32
    scf.if %9 {
      %c0_2 = arith.constant 0 : index
      %c0_3 = arith.constant 0 : index
      %10 = vector.load %arg3[%c0_2, %c0_3] : memref<8x128xf32, #tpu.memory_space<vmem>>, vector<8x128xf32>
      %c0_4 = arith.constant 0 : index
      %c0_5 = arith.constant 0 : index
      %11 = vector.load %arg4[%c0_4, %c0_5] : memref<8x128xf32, #tpu.memory_space<vmem>>, vector<8x128xf32>
      %c0_6 = arith.constant 0 : index
      %c0_7 = arith.constant 0 : index
      %12 = vector.load %arg5[%c0_6, %c0_7] : memref<8x128xf32, #tpu.memory_space<vmem>>, vector<8x128xf32>
      %c0_8 = arith.constant 0 : index
      %c0_9 = arith.constant 0 : index
      %13 = vector.load %arg6[%c0_8, %c0_9] : memref<8x128xf32, #tpu.memory_space<vmem>>, vector<8x128xf32>
      %14 = math.log %10 : vector<8x128xf32>
      %cst = arith.constant -1.000000e+02 : f32
      %15 = vector.broadcast %cst : f32 to vector<8x128xf32>
      %16 = arith.maximumf %14, %15 : vector<8x128xf32>
      %cst_10 = arith.constant 1.000000e+00 : f32
      %17 = vector.broadcast %cst_10 : f32 to vector<8x128xf32>
      %18 = arith.subf %17, %10 : vector<8x128xf32>
      %19 = math.log %18 : vector<8x128xf32>
      %cst_11 = arith.constant -1.000000e+02 : f32
      %20 = vector.broadcast %cst_11 : f32 to vector<8x128xf32>
      %21 = arith.maximumf %19, %20 : vector<8x128xf32>
      %22 = arith.mulf %11, %16 : vector<8x128xf32>
      %cst_12 = arith.constant 1.000000e+00 : f32
      %23 = vector.broadcast %cst_12 : f32 to vector<8x128xf32>
      %24 = arith.subf %23, %11 : vector<8x128xf32>
      %25 = arith.mulf %24, %21 : vector<8x128xf32>
      %26 = arith.addf %22, %25 : vector<8x128xf32>
      %cst_13 = arith.constant 0.000000e+00 : f32
      %27 = vector.broadcast %cst_13 : f32 to vector<8x128xf32>
      %28 = arith.subf %27, %26 : vector<8x128xf32>
      %cst_14 = arith.constant 1.000000e-03 : f32
      %29 = vector.broadcast %cst_14 : f32 to vector<8x128xf32>
      %30 = arith.addf %10, %29 : vector<8x128xf32>
      %cst_15 = arith.constant 9.980040e-01 : f32
      %31 = vector.broadcast %cst_15 : f32 to vector<8x128xf32>
      %32 = arith.mulf %30, %31 : vector<8x128xf32>
      %cst_16 = arith.constant 1.001000e+00 : f32
      %33 = vector.broadcast %cst_16 : f32 to vector<8x128xf32>
      %34 = arith.subf %33, %10 : vector<8x128xf32>
      %cst_17 = arith.constant 9.980040e-01 : f32
      %35 = vector.broadcast %cst_17 : f32 to vector<8x128xf32>
      %36 = arith.mulf %34, %35 : vector<8x128xf32>
      %37 = arith.addf %12, %13 : vector<8x128xf32>
      %cst_18 = arith.constant 1.000000e+00 : f32
      %38 = vector.broadcast %cst_18 : f32 to vector<8x128xf32>
      %39 = arith.divf %38, %37 : vector<8x128xf32>
      %40 = arith.mulf %13, %39 : vector<8x128xf32>
      %41 = arith.mulf %12, %39 : vector<8x128xf32>
      %42 = math.log %40 : vector<8x128xf32>
      %43 = math.log %32 : vector<8x128xf32>
      %44 = arith.subf %42, %43 : vector<8x128xf32>
      %45 = arith.mulf %40, %44 : vector<8x128xf32>
      %46 = math.log %41 : vector<8x128xf32>
      %47 = math.log %36 : vector<8x128xf32>
      %48 = arith.subf %46, %47 : vector<8x128xf32>
      %49 = arith.mulf %41, %48 : vector<8x128xf32>
      %50 = arith.addf %45, %49 : vector<8x128xf32>
      %cst_19 = arith.constant 5.000000e-01 : f32
      %51 = vector.broadcast %cst_19 : f32 to vector<8x128xf32>
      %52 = arith.mulf %51, %50 : vector<8x128xf32>
      %53 = arith.subf %28, %52 : vector<8x128xf32>
      %c1024_i32_20 = arith.constant 1024 : i32
      %54 = arith.addi %6, %c1024_i32_20 : i32
      %55 = arith.cmpi sle, %54, %3 : i32
      %56 = arith.extui %55 : i1 to i32
      %c0_i32_21 = arith.constant 0 : i32
      %57 = arith.cmpi ne, %56, %c0_i32_21 : i32
      scf.if %57 {
        %c0_23 = arith.constant 0 : index
        %c0_24 = arith.constant 0 : index
        %c0_25 = arith.constant 0 : index
        %61 = vector.load %arg7[%c0_23, %c0_24, %c0_25] : memref<1x8x128xf32, #tpu.memory_space<vmem>>, vector<1x8x128xf32>
        %62 = vector.shape_cast %53 : vector<8x128xf32> to vector<1x8x128xf32>
        %cst_26 = arith.constant dense<0.000000e+00> : vector<8x128xf32>
        %63 = vector.multi_reduction <add>, %62, %cst_26 [0] : vector<1x8x128xf32> to vector<8x128xf32>
        %64 = vector.shape_cast %63 : vector<8x128xf32> to vector<1x8x128xf32>
        %65 = arith.addf %61, %64 : vector<1x8x128xf32>
        %c0_27 = arith.constant 0 : index
        %c0_28 = arith.constant 0 : index
        %c0_29 = arith.constant 0 : index
        %66 = vector.load %arg7[%c0_27, %c0_28, %c0_29] : memref<1x8x128xf32, #tpu.memory_space<vmem>>, vector<1x8x128xf32>
        tpu.vector_store %arg7[%c0_27, %c0_28, %c0_29], %65 {strides = array<i32>} : memref<1x8x128xf32, #tpu.memory_space<vmem>>, vector<1x8x128xf32>,
      } else {
      }
      %58 = arith.cmpi sgt, %54, %3 : i32
      %59 = arith.extui %58 : i1 to i32
      %c0_i32_22 = arith.constant 0 : i32
      %60 = arith.cmpi ne, %59, %c0_i32_22 : i32
      scf.if %60 {
        %61 = tpu.iota {dimensions = array<i32: 0>} : vector<8x128xi32>
        %62 = tpu.iota {dimensions = array<i32: 1>} : vector<8x128xi32>
        %c128_i32 = arith.constant 128 : i32
        %63 = vector.broadcast %c128_i32 : i32 to vector<8x128xi32>
        %64 = arith.muli %61, %63 : vector<8x128xi32>
        %65 = vector.broadcast %6 : i32 to vector<8x128xi32>
        %66 = arith.addi %65, %64 : vector<8x128xi32>
        %67 = arith.addi %66, %62 : vector<8x128xi32>
        %68 = vector.broadcast %3 : i32 to vector<8x128xi32>
        %69 = arith.cmpi slt, %67, %68 : vector<8x128xi32>
        %cst_23 = arith.constant 0.000000e+00 : f32
        %70 = vector.broadcast %cst_23 : f32 to vector<8x128xf32>
        %71 = arith.select %69, %53, %70 : vector<8x128xi1>, vector<8x128xf32>
        %c0_24 = arith.constant 0 : index
        %c0_25 = arith.constant 0 : index
        %c0_26 = arith.constant 0 : index
        %72 = vector.load %arg7[%c0_24, %c0_25, %c0_26] : memref<1x8x128xf32, #tpu.memory_space<vmem>>, vector<1x8x128xf32>
        %73 = vector.shape_cast %71 : vector<8x128xf32> to vector<1x8x128xf32>
        %cst_27 = arith.constant dense<0.000000e+00> : vector<8x128xf32>
        %74 = vector.multi_reduction <add>, %73, %cst_27 [0] : vector<1x8x128xf32> to vector<8x128xf32>
        %75 = vector.shape_cast %74 : vector<8x128xf32> to vector<1x8x128xf32>
        %76 = arith.addf %72, %75 : vector<1x8x128xf32>
        %c0_28 = arith.constant 0 : index
        %c0_29 = arith.constant 0 : index
        %c0_30 = arith.constant 0 : index
        %77 = vector.load %arg7[%c0_28, %c0_29, %c0_30] : memref<1x8x128xf32, #tpu.memory_space<vmem>>, vector<1x8x128xf32>
        tpu.vector_store %arg7[%c0_28, %c0_29, %c0_30], %76 {strides = array<i32>} : memref<1x8x128xf32, #tpu.memory_space<vmem>>, vector<1x8x128xf32>,
      } else {
      }
    } else {
    }
    return
  }
  func.func @transform_0(%arg0: i32, %arg1: i32, %arg2: memref<1xi32, #tpu.memory_space<smem>>) -> (i32, i32) {
    %c1_i32 = arith.constant 1 : i32
    %0 = arith.muli %arg0, %c1_i32 : i32
    %1 = arith.addi %0, %arg1 : i32
    %c0_i32 = arith.constant 0 : i32
    %c0_i32_0 = arith.constant 0 : i32
    return %1, %c0_i32 : i32, i32
  }
  func.func @transform_1(%arg0: i32, %arg1: i32, %arg2: memref<1xi32, #tpu.memory_space<smem>>) -> (i32, i32) {
    %c1_i32 = arith.constant 1 : i32
    %0 = arith.muli %arg0, %c1_i32 : i32
    %1 = arith.addi %0, %arg1 : i32
    %c0_i32 = arith.constant 0 : i32
    %c0_i32_0 = arith.constant 0 : i32
    return %1, %c0_i32 : i32, i32
  }
  func.func @transform_2(%arg0: i32, %arg1: i32, %arg2: memref<1xi32, #tpu.memory_space<smem>>) -> (i32, i32) {
    %c1_i32 = arith.constant 1 : i32
    %0 = arith.muli %arg0, %c1_i32 : i32
    %1 = arith.addi %0, %arg1 : i32
    %c0_i32 = arith.constant 0 : i32
    %c0_i32_0 = arith.constant 0 : i32
    return %1, %c0_i32 : i32, i32
  }
  func.func @transform_3(%arg0: i32, %arg1: i32, %arg2: memref<1xi32, #tpu.memory_space<smem>>) -> (i32, i32) {
    %c1_i32 = arith.constant 1 : i32
    %0 = arith.muli %arg0, %c1_i32 : i32
    %1 = arith.addi %0, %arg1 : i32
    %c0_i32 = arith.constant 0 : i32
    %c0_i32_0 = arith.constant 0 : i32
    return %1, %c0_i32 : i32, i32
  }
  func.func @transform_4(%arg0: i32, %arg1: i32, %arg2: memref<1xi32, #tpu.memory_space<smem>>) -> (i32, i32, i32) {
    %c0_i32 = arith.constant 0 : i32
    %c0_i32_0 = arith.constant 0 : i32
    %c0_i32_1 = arith.constant 0 : i32
    return %arg0, %c0_i32, %c0_i32_0 : i32, i32, i32
  }
}

</mosaic_0001>

<bundles_post_ra>
// kernel: tpu_custom_call.1
= control target key start
LH: loop header
LB: loop body
LE: loop exit
PB: predicated region body
PF: predicated region fallthrough
CT: control target
= control target key end

     0   :  { %s1192_s0 = inlined_call_operand.<no memory space> [shape: s32[1], index: 0, kind: input, shape index: {}]   ;;  %s1193_s1 = inlined_call_operand.hbm [shape: f32[16,128], index: 1, kind: input, shape index: {}]   ;;  %s1194_s2 = inlined_call_operand.hbm [shape: f32[16,128], index: 2, kind: input, shape index: {}]   ;;  %s1195_s3 = inlined_call_operand.hbm [shape: f32[16,128], index: 3, kind: input, shape index: {}]   ;;  %s1196_s4 = inlined_call_operand.hbm [shape: f32[16,128], index: 4, kind: input, shape index: {}]   ;;  %s1197_s5 = inlined_call_operand.hbm [shape: f32[2,8,128], index: 5, kind: output, shape index: {}]  }
   0x1   :  { %1203 = sst [smem:[#allocation22_spill]] %s1193_s1 }
   0x2   :  { %1204 = sst [smem:[#allocation23_spill]] %s1194_s2 }
   0x3   :  { %10 = sst [smem:[#allocation3]] %s1192_s0 }
   0x4   :  { %11 = vsyncpa [#allocation5], 0 }
   0x5   :  { %13 = vsyncpa [#allocation5 + $0x1], 0 }
   0x6   :  { %14 = vsyncpa [#allocation8], 0 }
   0x7   :  { %16 = vsyncpa [#allocation8 + $0x1], 0 }
   0x8   :  { %17 = vsyncpa [#allocation11], 0 }
   0x9   :  { %19 = vsyncpa [#allocation11 + $0x1], 0 }
   0xa   :  { %20 = vsyncpa [#allocation6], 0 }
   0xb   :  { %22 = vsyncpa [#allocation6 + $0x1], 0  ;;  %s980_s20 = smov 0   ;;  %s982_s21 = smov 0  }
   0xc   :  { %s984_s22 = smov 0   ;;  %s986_s23 = smov 0  }
   0xd   :  { %s988_s24 = smov 0   ;;  %s990_s25 = smov 0  }
   0xe LB: > { %1205 = sst [smem:[#allocation17_spill]] %s932_s22  ;;  %s1011_s0 = sadd.s32 4294967295, %s944_s25   ;;  %s944_s25 = sphi %s990_s25, %s28_s25   ;;  %s940_s24 = sphi %s988_s24, %s1222_s24   ;;  %s936_s23 = sphi %s986_s23, %s1221_s23   ;;  %s932_s22 = sphi %s984_s22, %s1220_s22   ;;  %s928_s21 = sphi %s982_s21, %s1224_s21   ;;  %s924_s20 = sphi %s980_s20, %s1223_s20  }
   0xf   : > { %1206 = sst [smem:[#allocation18_spill]] %s940_s24  ;;  %s617_s26 = sadd.s32 4294967294, %s944_s25  }
  0x10   : > { %1207 = sst [smem:[#allocation19_spill]] %s944_s25  ;;  %s40_s27 = sadd.s32 1, %s940_s24 }
  0x11   : > { %s49_s28 = sadd.s32 1, %s932_s22  ;;  %p42_p0 = scmp.ge.s32.totalorder %s40_s27, 2 }
  0x12   : > { %p56_p1 = scmp.ne.s32.totalorder %s932_s22, %s928_s21  ;;  %p57_p2 = scmp.eq.s32.totalorder %s944_s25, 0 }
  0x13   : > { %p62_p3 = scmp.ne.s32.totalorder %s928_s21, %s924_s20  ;;  %s1226_s27 = smov (%p42_p0, %s40_s27), 0 }
  0x14   : > { %1208 = sst [smem:[#allocation20_spill]] %s1226_s27  ;;  %p1023_p4 = por %p57_p2, %p56_p1 }
  0x15   : > { %p63_p5 = scmp.eq.s32.totalorder %s1011_s0, 0  ;;  %s46_s30 = ssub.s32 %s940_s24, %s1226_s27 }
  0x16   : > { %p170_p6 = scmp.eq.s32.totalorder %s1011_s0, 1  ;;  %p47_p7 = scmp.eq.s32.totalorder %s46_s30, 0 }
  0x17   : > { %p1031_p8 = por %p63_p5, %p62_p3  ;;  %p176_p10 = scmp.eq.s32.totalorder %s617_s26, 1 }
  0x18   : > { %p1035_p9 = por %p170_p6, %p56_p1  ;;  %p619_p12 = scmp.ge.s32.totalorder %s944_s25, 2 }
  0x19   : > { %s1040_s8 = scalar_select %p47_p7, %s932_s22, %s49_s28  }
  0x1a   : > { %p1042_p11 = por %p176_p10, %p62_p3  ;;  %p669_p13 = scmp.lt.s32.totalorder %s944_s25, 2 }
  0x1b   : > { %1212 = sst [smem:[#allocation21_spill]] %s1040_s8  ;;  %s1049_s10 = sand.u32 1, %s932_s22  }
  0x1c   : > { %s1052_s11 = sshll.u32 %s1049_s10, 3  ;;  %s1055_s12 = sshll.u32 %s940_s24, 3 }
  0x1d   : > { %p1059_p0 = pnand %p669_p13, %p1023_p4  ;;  %s216_s14 = sand.u32 1, %s944_s25  }
  0x1e   : > { %s1215_s2 = sld [smem:[#allocation23_spill]]  ;;  %s220_s19 = scalar_lea.vmem [#allocation7], %s1052_s11 }
  0x1f   : > { %s229_s26 = sshll.u32 %s220_s19, 4  ;;  %s217_s28 = scalar_lea.sflag [#allocation8], %s216_s14  ;;  %s230_s26 = int_to_ptr.vmem [resolvable:$true] %s229_s26 }
  0x20   : > { %p628_p1 = scmp.ge.s32.totalorder %s944_s25, 1  ;;  %p274_p2 = scmp.lt.s32.totalorder %s944_s25, 3 }
  0x21   : > { %s1217_s1 = sld [smem:[#allocation22_spill]]  ;;  %s200_s19 = scalar_lea.vmem [#allocation4], %s1052_s11 }
  0x22   : > { %p1073_p3 = pnand %p628_p1, %p274_p2  ;;  %s197_s14 = scalar_lea.sflag [#allocation5], %s1049_s10 }
  0x23   : > { %s245_s27 = scalar_lea.hbm %s1195_s3, %s1055_s12  ;;  %s240_s8 = scalar_lea.vmem [#allocation9], %s1052_s11 }
  0x24   : > { %s225_s17 = scalar_lea.hbm %s1215_s2, %s1055_s12  ;;  %s209_s2 = sshll.u32 %s200_s19, 4  ;;  %s210_s2 = int_to_ptr.vmem [resolvable:$true] %s209_s2 }
  0x25   : > { %s227_s18 = sshll.u32 %s225_s17, 4  ;;  %s247_s24 = sshll.u32 %s245_s27, 4  ;;  %s228_s18 = int_to_ptr.hbm [resolvable:$true] %s227_s18  ;;  %s248_s24 = int_to_ptr.hbm [resolvable:$true] %s247_s24 }
  0x26   : > { %658 = dma.hbm_to_vmem [thread:$0]  (!%p1059_p0), %s228_s18, 128, %s230_s26, %s217_s28  }
  0x27   : > { %s205_s16 = scalar_lea.hbm %s1217_s1, %s1055_s12  ;;  %s249_s30 = sshll.u32 %s240_s8, 4  ;;  %s250_s30 = int_to_ptr.vmem [resolvable:$true] %s249_s30 }
  0x28   : > { %s207_s17 = sshll.u32 %s205_s16, 4  ;;  %s265_s19 = scalar_lea.hbm %s1196_s4, %s1055_s12  ;;  %s208_s17 = int_to_ptr.hbm [resolvable:$true] %s207_s17 }
  0x29   : > { %655 = dma.hbm_to_vmem [thread:$0]  (!%p1059_p0), %s208_s17, 128, %s210_s2, %s197_s14  }
  0x2a   : > { %661 = dma.hbm_to_vmem [thread:$0]  (!%p1059_p0), %s248_s24, 128, %s250_s30, %s217_s28  }
  0x2b   : > { %s260_s1 = scalar_lea.vmem [#allocation10], %s1052_s11  ;;  %s267_s25 = sshll.u32 %s265_s19, 4  ;;  %s268_s25 = int_to_ptr.hbm [resolvable:$true] %s267_s25 }
  0x2c   : > { %s269_s22 = sshll.u32 %s260_s1, 4  ;;  %s257_s2 = scalar_lea.sflag [#allocation11], %s1049_s10  ;;  %s270_s22 = int_to_ptr.vmem [resolvable:$true] %s269_s22 }
  0x2d   : > { %664 = dma.hbm_to_vmem [thread:$0]  (!%p1059_p0), %s268_s25, 128, %s270_s22, %s257_s2  }
  0x2e   : > { %278 = sbr.rel (%p1073_p3) target bundleno = 153 (0x99), region = 36  ;;  %s1103_s27 = sand.u32 (!%p1073_p3), 1, %s928_s21  }
  0x2f   : > { %s1106_s24 = sshll.u32 (!%p1073_p3), %s1103_s27, 3  ;;  %s281_s8 = scalar_lea.sflag (!%p1073_p3), [#allocation5], %s1103_s27 }
  0x30   : > { %s284_s1 = scalar_lea.vmem (!%p1073_p3), [#allocation4], %s1106_s24 }
  0x33   : > { %907 = dma.done.wait (%p1031_p8), %s281_s8, 128  }
  0x34   : > { %909 = vsyncadd (%p1031_p8), %s281_s8, 4294967168  ;;  %s290_s22 = sand.u32 1, %s1011_s0   ;;  %s294_s10 = scalar_lea.vmem [#allocation7], %s1106_s24 }
  0x35   : > { %s291_s25 = scalar_lea.sflag [#allocation8], %s290_s22 }
  0x36   : > { %911 = dma.done.wait (%p1031_p8), %s291_s25, 256  }
  0x37   : > { %913 = vsyncadd (%p1031_p8), %s291_s25, 4294967040  ;;  %s304_s11 = scalar_lea.vmem [#allocation9], %s1106_s24  ;;  %s311_s12 = scalar_lea.sflag [#allocation11], %s1103_s27 }
  0x38   : > { %s314_s13 = scalar_lea.vmem [#allocation10], %s1106_s24 }
  0x39   : > { %915 = dma.done.wait (%p1031_p8), %s311_s12, 128  }
  0x3a   : > { %917 = vsyncadd (%p1031_p8), %s311_s12, 4294967168  ;;  %s1128_s0 = sshll.u32 %s936_s23, 10  ;;  %s1130_s28 = sld [smem:[#allocation3]]  ;;  %v946_v0 = vmov 0.0  }
  0x3b   : > { %s1133_s29 = scalar_lea.vmem [#allocation12], %s1106_s24 }
  0x3c   : > { %363 = vst [vmem:[%s1133_s29] sm:$0xff] %v946_v0 }
  0x40   : > { %p635_p4 = scmp.ge.s32.totalorder %s1128_s0, %s1130_s28 }
  0x41   : > { %s424_s17 = sadd.s32 (!%p635_p4), 1024, %s1128_s0 }
  0x42   : > { %370 = sbr.rel (%p635_p4) target bundleno = 138 (0x8a), region = 60  ;;  %p636_p5 = scmp.gt.s32.totalorder (!%p635_p4), %s424_s17, %s1130_s28 }
  0x47   : > { %v373_v1 = vld [vmem:[%s304_s11] sm:$0xff]  ;;  %v374_v2 = vld [vmem:[%s314_s13] sm:$0xff] }
  0x48   : > { %v391_v3 = vadd.f32 %v374_v2, %v373_v1  ;;  %v371_v4 = vld [vmem:[%s284_s1] sm:$0xff]  ;;  %v372_v26 = vld [vmem:[%s294_s10] sm:$0xff] }
  0x49   : > { %v378_v5 = vsub.f32 1.0, %v371_v4  ;;  %v387_v7 = vadd.f32 0.001, %v371_v4  ;;  %v389_v9 = vsub.f32 1.001, %v371_v4  ;;  %v383_v30 = vsub.f32 1.0, %v372_v26 }
  0x4a   : > { %720 = vrcp.f32 %v391_v3  ;;  %v403_v10 = vand.u32 2147483648, %v391_v3  ;;  %vm397_vm0 = vweird.f32 %v391_v3  ;;  %v401_v12 = vand.u32 2147483647, %v391_v3 }
  0x4b   : > { %722 = vlog2.f32 %v371_v4  ;;  %v388_v13 = vmul.f32 0.998004, %v387_v7  ;;  %v390_v15 = vmul.f32 0.998004, %v389_v9 }
  0x4c   : > { %724 = vlog2.f32 %v378_v5  ;;  %v404_v16 = vor.u32 1.1754944e-38, %v403_v10  ;;  %vm402_vm3 = vcmp.eq.f32.partialorder %v401_v12, 8.507059e+37 }
  0x4d   : > { %726 = vlog2.f32 %v388_v13 }
  0x4e   : > { %728 = vlog2.f32 %v390_v15 }
  0x50   : > { %v721_v6 = vpop.eup %720 }
  0x51   : > { %v393_v8 = vmul.f32 %v721_v6, %v391_v3  ;;  %vm398_vm1 = vweird.f32 %v721_v6  ;;  %v723_v17 = vpop.eup %722 }
  0x52   : > { %vm399_vm2 = vmor %vm397_vm0, %vm398_vm1  ;;  %v725_v19 = vpop.eup %724  ;;  %v376_v22 = vmul.f32 0.6931472, %v723_v17 }
  0x53   : > { %v394_v11 = vsub.f32 1.0, %v393_v8  ;;  %v380_v23 = vmul.f32 0.6931472, %v725_v19  ;;  %v727_v27 = vpop.eup %726 }
  0x54   : > { %v377_v28 = vmax.f32 %v376_v22, -100.0  ;;  %v729_v31 = vpop.eup %728  ;;  %v412_v32 = vmul.f32 0.6931472, %v727_v27 }
  0x55   : > { %v395_v14 = vmul.f32 %v721_v6, %v394_v11  ;;  %v381_v29 = vmax.f32 %v380_v23, -100.0  ;;  %v418_v36 = vmul.f32 0.6931472, %v729_v31 }
  0x56   : > { %v382_v34 = vmul.f32 %v377_v28, %v372_v26 }
  0x57   : > { %v396_v18 = vadd.f32 %v721_v6, %v395_v14  ;;  %v384_v35 = vmul.f32 %v383_v30, %v381_v29 }
  0x59   : > { %v400_v20 = vsel %vm399_vm2, %v721_v6, %v396_v18  ;;  %v385_v41 = vadd.f32 %v384_v35, %v382_v34 }
  0x5a   : > { %v405_v21 = vsel %vm402_vm3, %v404_v16, %v400_v20 }
  0x5b   : > { %v407_v24 = vmul.f32 %v405_v21, %v374_v2  ;;  %v408_v25 = vmul.f32 %v405_v21, %v373_v1  ;;  %v386_v45 = vsub.f32 0.0, %v385_v41 }
  0x5d   : > { %730 = vlog2.f32 %v407_v24 }
  0x5e   : > { %732 = vlog2.f32 %v408_v25 }
  0x63   : > { %v731_v33 = vpop.eup %730 }
  0x64   : > { %v733_v37 = vpop.eup %732  ;;  %v410_v38 = vmul.f32 0.6931472, %v731_v33 }
  0x65   : > { %v416_v39 = vmul.f32 0.6931472, %v733_v37 }
  0x66   : > { %v413_v40 = vsub.f32 %v410_v38, %v412_v32 }
  0x67   : > { %v419_v42 = vsub.f32 %v416_v39, %v418_v36 }
  0x68   : > { %v414_v43 = vmul.f32 %v413_v40, %v407_v24 }
  0x69   : > { %v420_v44 = vmul.f32 %v419_v42, %v408_v25 }
  0x6b   : > { %v421_v46 = vadd.f32 %v420_v44, %v414_v43  ;;  %428 = sbr.rel (%p636_p5) target bundleno = 116 (0x74), region = 64 }
  0x6d   : > { %v422_v47 = vmul.f32 0.5, %v421_v46 }
  0x6f   : > { %v423_v48 = vsub.f32 %v386_v45, %v422_v47 }
  0x70   : > { %v429_v49 = vld [vmem:[%s1133_s29] sm:$0xff] }
  0x71   : > { %v431_v50 = vadd.f32 %v429_v49, %v423_v48 }
  0x73   : > { %432 = vst [vmem:[%s1133_s29] sm:$0xff] %v431_v50 }
  0x74 PF: > { %p637_p6 = scmp.le.s32.totalorder %s424_s17, %s1130_s28 }
  0x76   : > { %436 = sbr.rel (%p637_p6) target bundleno = 138 (0x8a), region = 68 }
  0x7b   : > { %v437_v51 = vlaneseq  ;;  %v442_v53 = vstv %s1128_s0  ;;  %v445_v57 = vstv %s1130_s28  ;;  %v448_v59 = vld [vmem:[%s1133_s29] sm:$0xff] }
  0x7d   : > { %v438_v52 = vshrl.u32 %v437_v51, 7  ;;  %v440_v54 = vand.u32 127, %v437_v51 }
  0x7f   : > { %v441_v55 = vmul.u32 128, %v438_v52 }
  0x81   : > { %v443_v56 = vadd.s32 %v442_v53, %v441_v55 }
  0x83   : > { %v444_v58 = vadd.s32 %v443_v56, %v440_v54 }
  0x85   : > { %vm446_vm4 = vcmp.lt.s32.totalorder %v444_v58, %v445_v57 }
  0x86   : > { %v447_v60 = vsel %vm446_vm4, %v423_v48, 0.0 }
  0x87   : > { %v450_v61 = vadd.f32 %v448_v59, %v447_v60 }
  0x89   : > { %451 = vst [vmem:[%s1133_s29] sm:$0xff] %v450_v61 }
  0x8a PF: > { %s639_s6 = sshll.u32 %s936_s23, 3  ;;  %s465_s30 = sshll.u32 %s1133_s29, 4  ;;  %s466_s30 = int_to_ptr.vmem [resolvable:$true] %s465_s30 }
  0x8b   : > { %s463_s26 = scalar_lea.hbm %s1197_s5, %s639_s6  ;;  %s453_s16 = scalar_lea.sflag [#allocation6], %s1103_s27 }
  0x8c   : > { %s467_s15 = sshll.u32 %s463_s26, 4  ;;  %s874_s23 = scalar_lea.hbm %s1197_s5, 16  ;;  %s468_s15 = int_to_ptr.hbm [resolvable:$true] %s467_s15 }
  0x8d   : > { %s868_s19 = sshra.s32 %s468_s15, 4  ;;  %s869_s19 = int_to_ptr.hbm [resolvable:$true] %s868_s19 }
  0x8e   : > { %s870_s2 = scalar_lea.hbm %s869_s19, 8  ;;  %p875_p13 = scmp.lt.s32.totalorder %s869_s19, %s1197_s5 }
  0x8f   : > { %p871_p7 = scmp.ne.s32.totalorder %s869_s19, %s870_s2  ;;  %p876_p0 = scmp.lt.s32.totalorder %s874_s23, %s870_s2 }
  0x91   : > { %p872_p8 = pnand %p871_p7, %p1035_p9  ;;  %p877_p1 = por %p876_p0, %p875_p13 }
  0x93   : > { %p873_p10 = pneg %p872_p8 }
  0x95   : > { %p878_p2 = pnand %p877_p1, %p873_p10 }
  0x97   : > { %881 = shalt.err (!%p878_p2)
}
  0x98   : > { %650 = dma.vmem_to_hbm [thread:$0]  (%p1035_p9), %s466_s30, 128, %s468_s15, %s453_s16  }
  0x99 PF: > { %s1218_s27 = sld [smem:[#allocation19_spill]]  ;;  %s479_s25 = sand.u32 1, %s924_s20  }
  0x9a   : > { %p666_p3 = pnand %p619_p12, %p1042_p11  ;;  %s480_s10 = scalar_lea.sflag [#allocation6], %s479_s25 }
  0x9c   : > { %p667_p4 = pneg %p666_p3 }
  0x9e   : > { %919 = dma.done.wait (%p667_p4), %s480_s10, 128  }
  0x9f   : > { %921 = vsyncadd (%p667_p4), %s480_s10, 4294967168  ;;  %s28_s25 = sadd.s32 1, %s1218_s27   ;;  %s1219_s11 = sld [smem:[#allocation17_spill]] }
  0xa0   : > { %p25_p5 = scmp.ge.s32.totalorder %s28_s25, 4   ;;  %s1220_s22 = sld [smem:[#allocation21_spill]] }
  0xa1   : > { %s1221_s23 = sld [smem:[#allocation18_spill]]  ;;  %s1223_s20 = smov %s928_s21 }
  0xa2   : > { %s1222_s24 = sld [smem:[#allocation20_spill]]  ;;  %27 = sbr.rel (!%p25_p5) target bundleno = 14 (0xe), region = 134 }
  0xa5   : > { %s1224_s21 = smov %s1219_s11 }
  0xa7   :  { %486 = vsyncpa [#allocation5], 1 }
  0xa8   :  { %488 = vsyncpa [#allocation5 + $0x1], 1 }
  0xa9   :  { %489 = vsyncpa [#allocation8], 1 }
  0xaa   :  { %491 = vsyncpa [#allocation8 + $0x1], 1 }
  0xab   :  { %492 = vsyncpa [#allocation11], 1 }
  0xac   :  { %494 = vsyncpa [#allocation11 + $0x1], 1 }
  0xad   :  { %495 = vsyncpa [#allocation6], 1 }
  0xae   :  { %497 = vsyncpa [#allocation6 + $0x1], 1 }

</bundles_post_ra>
